<compile_context>
chip_gen: v7x
topology: tpu7x:2x2x1
jax: 0.10.0
libtpu: 0.0.40
codegen_flags: <defaults>
</compile_context>

<pallas_src>
import functools

import jax
import jax.numpy as jnp
from jax.experimental import pallas as pl
from jax.experimental.pallas import tpu as pltpu


def _joint_encoder_kernel(page_ref, sent_ref,
                          wd_ref, bd_ref, wm_ref, bm_ref,
                          out_ref, acc_ref, *, inv_s, valid_s, mask_seq):
    """Grid = (batch_tiles, seq_tiles); seq axis (last) is the reduction."""
    si = pl.program_id(1)

    @pl.when(si == 0)
    def _init():
        acc_ref[...] = jnp.zeros_like(acc_ref)

    tb, ts, d = page_ref.shape
    h = wd_ref.shape[1]

    # Collapse (TB, TS, D) -> (TB*TS, D): one big MXU matmul per encoder.
    # ts is a multiple of 8 (or the full padded S), so this merge does not
    # cross the (8,128) sublane tiling.
    page2d = page_ref[...].reshape(tb * ts, d)
    sent2d = sent_ref[...].reshape(tb * ts, d)

    # --- desc_encoder: linear -> relu (bf16 operands, f32 accumulate) -----
    h_d = jnp.dot(page2d, wd_ref[...],
                  preferred_element_type=jnp.float32) + bd_ref[...]
    h_d = jnp.maximum(h_d, 0.0)

    # --- mention_context_encoder: linear -> tanh ---------------------------
    h_m = jnp.dot(sent2d, wm_ref[...],
                  preferred_element_type=jnp.float32) + bm_ref[...]
    h_m = jnp.tanh(h_m)

    h_d3 = h_d.reshape(tb, ts, h)
    h_m3 = h_m.reshape(tb, ts, h)
    if mask_seq:
        # Zero out zero-padded sequence rows so they don't pollute the mean.
        seq_idx = si * ts + jax.lax.broadcasted_iota(jnp.int32, (tb, ts, 1), 1)
        valid = seq_idx < valid_s
        h_d3 = jnp.where(valid, h_d3, 0.0)
        h_m3 = jnp.where(valid, h_m3, 0.0)

    # Partial seq sums for this tile, accumulated directly into the two lane
    # halves of the packed (TB, 2H) slab [desc | mention] -- no lane concat.
    acc_ref[:, :h] += h_d3.sum(axis=1)
    acc_ref[:, h:] += h_m3.sum(axis=1)

    @pl.when(si == pl.num_programs(1) - 1)
    def _finalize():
        out_ref[...] = (acc_ref[...] * inv_s).astype(out_ref.dtype)


def _round_up(x, m):
    return ((x + m - 1) // m) * m


def _vmem_budgets():
    """(vmem_limit_bytes, activation-tile byte budget) per TPU generation."""
    try:
        cap = pltpu.get_tpu_info().vmem_capacity_bytes
    except Exception:
        cap = 64 * 1024 * 1024            # conservative: assume v7x-sized VMEM
    if cap >= 100 * 1024 * 1024:           # v5e / v6e: 128 MiB physical
        return 96 * 1024 * 1024, 16 * 1024 * 1024
    # v7x: 64 MiB per TensorCore -> leave compiler/pipeline headroom
    return 52 * 1024 * 1024, 6 * 1024 * 1024


def _choose_tiles(B, S, D, act_budget, op_itemsize):
    # Batch tile: full B when small (full-extent block is always legal);
    # otherwise 8 so the packed (tb, 2H) output block stays sublane-aligned
    # and nb >= 2 gives v7x's second TensorCore work via the parallel axis.
    if B <= 8:
        tb, b_pad = B, B
    else:
        tb, b_pad = 8, _round_up(B, 8)
    # Sequence tile: grow ts first; budget covers 2 inputs x 2 buffers.
    ts_target = max(8, act_budget // (4 * tb * D * op_itemsize))
    ts = min(_round_up(S, 8), (ts_target // 8) * 8)
    s_pad = _round_up(S, ts)
    return tb, ts, b_pad, s_pad


def joint_encoder(data, params, *, operand_dtype=jnp.bfloat16):
    """data = (embedded_sentence [B,S,D], embedded_page_contents [B,S,D]).
    Returns (desc_embeds [B,H], mention_context_embeds [B,H]) in f32.
    Use operand_dtype=jnp.float32 for an exact-reference mode."""
    sent, page = data
    wd, bd, wm, bm = params
    B, S, D = page.shape
    H = wd.shape[1]

    vmem_limit, act_budget = _vmem_budgets()
    op_itemsize = jnp.dtype(operand_dtype).itemsize
    tb, ts, b_pad, s_pad = _choose_tiles(B, S, D, act_budget, op_itemsize)

    # Cast matmul operands (bf16 by default); biases stay f32 for the f32
    # bias/activation/mean path inside the kernel.
    page_op = page.astype(operand_dtype)
    sent_op = sent.astype(operand_dtype)
    wd_op = wd.astype(operand_dtype)
    wm_op = wm.astype(operand_dtype)
    bd32 = bd.astype(jnp.float32)
    bm32 = bm.astype(jnp.float32)

    if b_pad != B or s_pad != S:
        pad = ((0, b_pad - B), (0, s_pad - S), (0, 0))
        page_op = jnp.pad(page_op, pad)
        sent_op = jnp.pad(sent_op, pad)

    nb, ns = b_pad // tb, s_pad // ts
    kernel = functools.partial(
        _joint_encoder_kernel,
        inv_s=1.0 / float(S), valid_s=S, mask_seq=(s_pad != S))

    def _call(single_buffer_weights):
        w_kwargs = {}
        if single_buffer_weights:
            # Constant index_map -> never re-fetched; single-buffer to free VMEM
            # for bigger activation tiles (matters most inside v7x's 64 MiB).
            w_kwargs = dict(pipeline_mode=pl.Buffered(1))
        grid_spec = pltpu.PrefetchScalarGridSpec(
            num_scalar_prefetch=0,
            grid=(nb, ns),
            in_specs=[
                pl.BlockSpec((tb, ts, D), lambda ib, si: (ib, si, 0)),    # page
                pl.BlockSpec((tb, ts, D), lambda ib, si: (ib, si, 0)),    # sentence
                pl.BlockSpec((D, H), lambda ib, si: (0, 0), **w_kwargs),  # Wd
                pl.BlockSpec((1, H), lambda ib, si: (0, 0), **w_kwargs),  # bd
                pl.BlockSpec((D, H), lambda ib, si: (0, 0), **w_kwargs),  # Wm
                pl.BlockSpec((1, H), lambda ib, si: (0, 0), **w_kwargs),  # bm
            ],
            out_specs=pl.BlockSpec((tb, 2 * H), lambda ib, si: (ib, 0)),
            scratch_shapes=[pltpu.VMEM((tb, 2 * H), jnp.float32)],
        )
        return pl.pallas_call(
            kernel,
            grid_spec=grid_spec,
            out_shape=jax.ShapeDtypeStruct((b_pad, 2 * H), jnp.float32),
            compiler_params=pltpu.CompilerParams(
                dimension_semantics=("parallel", "arbitrary"),
                vmem_limit_bytes=vmem_limit,
            ),
        )(page_op, sent_op, wd_op, bd32, wm_op, bm32)

    try:
        out = _call(True)
    except Exception:
        # TODO(synk): this Pallas build rejected single-buffered (Buffered(1))
        # weight blocks; fall back to default double-buffering (same results).
        out = _call(False)

    out = out[:B]                       # drop padded batch rows
    desc_embeds = out[:, :H]
    mention_context_embeds = out[:, H:]
    return desc_embeds, mention_context_embeds


def _reference(data, params):
    sent, page = data
    wd, bd, wm, bm = params
    h_d = jnp.maximum(jnp.einsum("bsd,dh->bsh", page, wd) + bd, 0.0)
    h_m = jnp.tanh(jnp.einsum("bsd,dh->bsh", sent, wm) + bm)
    return jnp.mean(h_d, axis=1), jnp.mean(h_m, axis=1)


if __name__ == "__main__":
    B, S, D, H = 2, 8, 32, 32

    key = jax.random.PRNGKey(0)
    k_sent, k_page, k_wd, k_bd, k_wm, k_bm = jax.random.split(key, 6)

    embedded_sentence = jax.random.normal(k_sent, (B, S, D), jnp.float32)
    embedded_page     = jax.random.normal(k_page, (B, S, D), jnp.float32)
    data = (embedded_sentence, embedded_page)   # mirrors the (data[0], data[1]) tuple

    # Deterministic synthetic parameters for the two injected encoders.
    wd = jax.random.normal(k_wd, (D, H), jnp.float32) * (1.0 / jnp.sqrt(D))
    bd = jax.random.normal(k_bd, (1, H), jnp.float32) * 0.01
    wm = jax.random.normal(k_wm, (D, H), jnp.float32) * (1.0 / jnp.sqrt(D))
    bm = jax.random.normal(k_bm, (1, H), jnp.float32) * 0.01
    params = (wd, bd, wm, bm)

    desc_embeds, mention_embeds = joint_encoder(data, params)
    jax.block_until_ready((desc_embeds, mention_embeds))

    ref_desc, ref_ment = _reference(data, params)
    assert desc_embeds.shape == (B, H) and mention_embeds.shape == (B, H)
    # bf16 matmul operands + f32 accumulation -> relaxed tolerance vs the
    # exact-f32 reference (use operand_dtype=jnp.float32 for exact checking).
    assert jnp.allclose(desc_embeds, ref_desc, atol=5e-2, rtol=5e-2)
    assert jnp.allclose(mention_embeds, ref_ment, atol=5e-2, rtol=5e-2)

    print("KERNEL_OK")
</pallas_src>

<mosaic_0001>
module attributes {stable_mosaic.version = 11 : i64} {
  func.func @_joint_encoder_kernel(%arg0: i32, %arg1: i32, %arg2: memref<2x8x32xbf16, #tpu.memory_space<vmem>>, %arg3: memref<2x8x32xbf16, #tpu.memory_space<vmem>>, %arg4: memref<32x32xbf16, #tpu.memory_space<vmem>>, %arg5: memref<1x32xf32, #tpu.memory_space<vmem>>, %arg6: memref<32x32xbf16, #tpu.memory_space<vmem>>, %arg7: memref<1x32xf32, #tpu.memory_space<vmem>>, %arg8: memref<2x64xf32, #tpu.memory_space<vmem>>, %arg9: memref<2x64xf32, #tpu.memory_space<vmem>>) attributes {dimension_semantics = [#tpu.dimension_semantics<parallel>, #tpu.dimension_semantics<arbitrary>], iteration_bounds = array<i64: 1, 1>, scalar_prefetch = 0 : i64, scratch_operands = 1 : i64, tpu.core_type = #tpu.core_type<tc>, window_params = [{transform_indices = @transform_0, window_bounds = array<i64: 2, 8, 32>}, {transform_indices = @transform_1, window_bounds = array<i64: 2, 8, 32>}, {pipeline_mode = #tpu.pipeline_mode<synchronous>, transform_indices = @transform_2, window_bounds = array<i64: 32, 32>}, {pipeline_mode = #tpu.pipeline_mode<synchronous>, transform_indices = @transform_3, window_bounds = array<i64: 1, 32>}, {pipeline_mode = #tpu.pipeline_mode<synchronous>, transform_indices = @transform_4, window_bounds = array<i64: 32, 32>}, {pipeline_mode = #tpu.pipeline_mode<synchronous>, transform_indices = @transform_5, window_bounds = array<i64: 1, 32>}, {transform_indices = @transform_6, window_bounds = array<i64: 2, 64>}]} {
    %c0_i32 = arith.constant 0 : i32
    %0 = arith.cmpi eq, %arg1, %c0_i32 : i32
    %1 = arith.extui %0 : i1 to i32
    %c0_i32_0 = arith.constant 0 : i32
    %2 = arith.cmpi ne, %1, %c0_i32_0 : i32
    scf.if %2 {
      %cst_27 = arith.constant 0.000000e+00 : f32
      %33 = vector.broadcast %cst_27 : f32 to vector<2x64xf32>
      %c0_28 = arith.constant 0 : index
      %c0_29 = arith.constant 0 : index
      %34 = vector.load %arg9[%c0_28, %c0_29] : memref<2x64xf32, #tpu.memory_space<vmem>>, vector<2x64xf32>
      tpu.vector_store %arg9[%c0_28, %c0_29], %33 {strides = array<i32>} : memref<2x64xf32, #tpu.memory_space<vmem>>, vector<2x64xf32>,
    } else {
    }
    %c0 = arith.constant 0 : index
    %c0_1 = arith.constant 0 : index
    %c0_2 = arith.constant 0 : index
    %3 = vector.load %arg2[%c0, %c0_1, %c0_2] : memref<2x8x32xbf16, #tpu.memory_space<vmem>>, vector<2x8x32xbf16>
    %4 = vector.shape_cast %3 : vector<2x8x32xbf16> to vector<16x32xbf16>
    %c0_3 = arith.constant 0 : index
    %c0_4 = arith.constant 0 : index
    %c0_5 = arith.constant 0 : index
    %5 = vector.load %arg3[%c0_3, %c0_4, %c0_5] : memref<2x8x32xbf16, #tpu.memory_space<vmem>>, vector<2x8x32xbf16>
    %6 = vector.shape_cast %5 : vector<2x8x32xbf16> to vector<16x32xbf16>
    %c0_6 = arith.constant 0 : index
    %c0_7 = arith.constant 0 : index
    %7 = vector.load %arg4[%c0_6, %c0_7] : memref<32x32xbf16, #tpu.memory_space<vmem>>, vector<32x32xbf16>
    %cst = arith.constant dense<0.000000e+00> : vector<16x32xf32>
    %8 = tpu.matmul %4, %7, %cst {dimension_numbers = #tpu.dot_dimension_numbers<[1], [0], [0], [1], [0, 0, 1, 1], [], []>} : vector<16x32xbf16>, vector<32x32xbf16>, vector<16x32xf32> -> vector<16x32xf32>
    %c0_8 = arith.constant 0 : index
    %c0_9 = arith.constant 0 : index
    %9 = vector.load %arg5[%c0_8, %c0_9] : memref<1x32xf32, #tpu.memory_space<vmem>>, vector<1x32xf32>
    %10 = vector.broadcast %9 : vector<1x32xf32> to vector<16x32xf32>
    %11 = arith.addf %8, %10 : vector<16x32xf32>
    %cst_10 = arith.constant 0.000000e+00 : f32
    %12 = vector.broadcast %cst_10 : f32 to vector<16x32xf32>
    %13 = arith.maximumf %11, %12 : vector<16x32xf32>
    %c0_11 = arith.constant 0 : index
    %c0_12 = arith.constant 0 : index
    %14 = vector.load %arg6[%c0_11, %c0_12] : memref<32x32xbf16, #tpu.memory_space<vmem>>, vector<32x32xbf16>
    %cst_13 = arith.constant dense<0.000000e+00> : vector<16x32xf32>
    %15 = tpu.matmul %6, %14, %cst_13 {dimension_numbers = #tpu.dot_dimension_numbers<[1], [0], [0], [1], [0, 0, 1, 1], [], []>} : vector<16x32xbf16>, vector<32x32xbf16>, vector<16x32xf32> -> vector<16x32xf32>
    %c0_14 = arith.constant 0 : index
    %c0_15 = arith.constant 0 : index
    %16 = vector.load %arg7[%c0_14, %c0_15] : memref<1x32xf32, #tpu.memory_space<vmem>>, vector<1x32xf32>
    %17 = vector.broadcast %16 : vector<1x32xf32> to vector<16x32xf32>
    %18 = arith.addf %15, %17 : vector<16x32xf32>
    %19 = math.tanh %18 : vector<16x32xf32>
    %20 = vector.shape_cast %13 : vector<16x32xf32> to vector<2x8x32xf32>
    %21 = vector.shape_cast %19 : vector<16x32xf32> to vector<2x8x32xf32>
    %c0_16 = arith.constant 0 : index
    %c0_17 = arith.constant 0 : index
    %22 = vector.load %arg9[%c0_16, %c0_17] : memref<2x64xf32, #tpu.memory_space<vmem>>, vector<2x32xf32>
    %cst_18 = arith.constant dense<0.000000e+00> : vector<2x32xf32>
    %23 = vector.multi_reduction <add>, %20, %cst_18 [1] : vector<2x8x32xf32> to vector<2x32xf32>
    %24 = arith.addf %22, %23 : vector<2x32xf32>
    %c0_19 = arith.constant 0 : index
    %c0_20 = arith.constant 0 : index
    %25 = vector.load %arg9[%c0_19, %c0_20] : memref<2x64xf32, #tpu.memory_space<vmem>>, vector<2x32xf32>
    tpu.vector_store %arg9[%c0_19, %c0_20], %24 {strides = array<i32>} : memref<2x64xf32, #tpu.memory_space<vmem>>, vector<2x32xf32>,
    %c0_21 = arith.constant 0 : index
    %c32 = arith.constant 32 : index
    %26 = vector.load %arg9[%c0_21, %c32] : memref<2x64xf32, #tpu.memory_space<vmem>>, vector<2x32xf32>
    %cst_22 = arith.constant dense<0.000000e+00> : vector<2x32xf32>
    %27 = vector.multi_reduction <add>, %21, %cst_22 [1] : vector<2x8x32xf32> to vector<2x32xf32>
    %28 = arith.addf %26, %27 : vector<2x32xf32>
    %c0_23 = arith.constant 0 : index
    %c32_24 = arith.constant 32 : index
    %29 = vector.load %arg9[%c0_23, %c32_24] : memref<2x64xf32, #tpu.memory_space<vmem>>, vector<2x32xf32>
    tpu.vector_store %arg9[%c0_23, %c32_24], %28 {strides = array<i32>} : memref<2x64xf32, #tpu.memory_space<vmem>>, vector<2x32xf32>,
    %c0_i32_25 = arith.constant 0 : i32
    %30 = arith.cmpi eq, %arg1, %c0_i32_25 : i32
    %31 = arith.extui %30 : i1 to i32
    %c0_i32_26 = arith.constant 0 : i32
    %32 = arith.cmpi ne, %31, %c0_i32_26 : i32
    scf.if %32 {
      %c0_27 = arith.constant 0 : index
      %c0_28 = arith.constant 0 : index
      %33 = vector.load %arg9[%c0_27, %c0_28] : memref<2x64xf32, #tpu.memory_space<vmem>>, vector<2x64xf32>
      %cst_29 = arith.constant 1.250000e-01 : f32
      %34 = vector.broadcast %cst_29 : f32 to vector<2x64xf32>
      %35 = arith.mulf %33, %34 : vector<2x64xf32>
      %c0_30 = arith.constant 0 : index
      %c0_31 = arith.constant 0 : index
      %36 = vector.load %arg8[%c0_30, %c0_31] : memref<2x64xf32, #tpu.memory_space<vmem>>, vector<2x64xf32>
      tpu.vector_store %arg8[%c0_30, %c0_31], %35 {strides = array<i32>} : memref<2x64xf32, #tpu.memory_space<vmem>>, vector<2x64xf32>,
    } else {
    }
    return
  }
  func.func @transform_0(%arg0: i32, %arg1: i32) -> (i32, i32, i32) {
    %c0_i32 = arith.constant 0 : i32
    %c0_i32_0 = arith.constant 0 : i32
    return %arg0, %arg1, %c0_i32 : i32, i32, i32
  }
  func.func @transform_1(%arg0: i32, %arg1: i32) -> (i32, i32, i32) {
    %c0_i32 = arith.constant 0 : i32
    %c0_i32_0 = arith.constant 0 : i32
    return %arg0, %arg1, %c0_i32 : i32, i32, i32
  }
  func.func @transform_2(%arg0: i32, %arg1: i32) -> (i32, i32) {
    %c0_i32 = arith.constant 0 : i32
    %c0_i32_0 = arith.constant 0 : i32
    %c0_i32_1 = arith.constant 0 : i32
    return %c0_i32, %c0_i32_0 : i32, i32
  }
  func.func @transform_3(%arg0: i32, %arg1: i32) -> (i32, i32) {
    %c0_i32 = arith.constant 0 : i32
    %c0_i32_0 = arith.constant 0 : i32
    %c0_i32_1 = arith.constant 0 : i32
    return %c0_i32, %c0_i32_0 : i32, i32
  }
  func.func @transform_4(%arg0: i32, %arg1: i32) -> (i32, i32) {
    %c0_i32 = arith.constant 0 : i32
    %c0_i32_0 = arith.constant 0 : i32
    %c0_i32_1 = arith.constant 0 : i32
    return %c0_i32, %c0_i32_0 : i32, i32
  }
  func.func @transform_5(%arg0: i32, %arg1: i32) -> (i32, i32) {
    %c0_i32 = arith.constant 0 : i32
    %c0_i32_0 = arith.constant 0 : i32
    %c0_i32_1 = arith.constant 0 : i32
    return %c0_i32, %c0_i32_0 : i32, i32
  }
  func.func @transform_6(%arg0: i32, %arg1: i32) -> (i32, i32) {
    %c0_i32 = arith.constant 0 : i32
    %c0_i32_0 = arith.constant 0 : i32
    return %arg0, %c0_i32 : i32, i32
  }
}

module attributes {stable_mosaic.version = 11 : i64} {
  func.func @_joint_encoder_kernel(%arg0: i32, %arg1: i32, %arg2: memref<2x8x32xbf16, #tpu.memory_space<vmem>>, %arg3: memref<2x8x32xbf16, #tpu.memory_space<vmem>>, %arg4: memref<32x32xbf16, #tpu.memory_space<vmem>>, %arg5: memref<1x32xf32, #tpu.memory_space<vmem>>, %arg6: memref<32x32xbf16, #tpu.memory_space<vmem>>, %arg7: memref<1x32xf32, #tpu.memory_space<vmem>>, %arg8: memref<2x64xf32, #tpu.memory_space<vmem>>, %arg9: memref<2x64xf32, #tpu.memory_space<vmem>>) attributes {dimension_semantics = [#tpu.dimension_semantics<parallel>, #tpu.dimension_semantics<arbitrary>], iteration_bounds = array<i64: 1, 1>, scalar_prefetch = 0 : i64, scratch_operands = 1 : i64, tpu.core_type = #tpu.core_type<tc>, window_params = [{transform_indices = @transform_0, window_bounds = array<i64: 2, 8, 32>}, {transform_indices = @transform_1, window_bounds = array<i64: 2, 8, 32>}, {pipeline_mode = #tpu.pipeline_mode<synchronous>, transform_indices = @transform_2, window_bounds = array<i64: 32, 32>}, {pipeline_mode = #tpu.pipeline_mode<synchronous>, transform_indices = @transform_3, window_bounds = array<i64: 1, 32>}, {pipeline_mode = #tpu.pipeline_mode<synchronous>, transform_indices = @transform_4, window_bounds = array<i64: 32, 32>}, {pipeline_mode = #tpu.pipeline_mode<synchronous>, transform_indices = @transform_5, window_bounds = array<i64: 1, 32>}, {transform_indices = @transform_6, window_bounds = array<i64: 2, 64>}]} {
    %c0_i32 = arith.constant 0 : i32
    %0 = arith.cmpi eq, %arg1, %c0_i32 : i32
    %1 = arith.extui %0 : i1 to i32
    %c0_i32_0 = arith.constant 0 : i32
    %2 = arith.cmpi ne, %1, %c0_i32_0 : i32
    scf.if %2 {
      %cst_27 = arith.constant 0.000000e+00 : f32
      %33 = vector.broadcast %cst_27 : f32 to vector<2x64xf32>
      %c0_28 = arith.constant 0 : index
      %c0_29 = arith.constant 0 : index
      %34 = vector.load %arg9[%c0_28, %c0_29] : memref<2x64xf32, #tpu.memory_space<vmem>>, vector<2x64xf32>
      tpu.vector_store %arg9[%c0_28, %c0_29], %33 {strides = array<i32>} : memref<2x64xf32, #tpu.memory_space<vmem>>, vector<2x64xf32>,
    } else {
    }
    %c0 = arith.constant 0 : index
    %c0_1 = arith.constant 0 : index
    %c0_2 = arith.constant 0 : index
    %3 = vector.load %arg2[%c0, %c0_1, %c0_2] : memref<2x8x32xbf16, #tpu.memory_space<vmem>>, vector<2x8x32xbf16>
    %4 = vector.shape_cast %3 : vector<2x8x32xbf16> to vector<16x32xbf16>
    %c0_3 = arith.constant 0 : index
    %c0_4 = arith.constant 0 : index
    %c0_5 = arith.constant 0 : index
    %5 = vector.load %arg3[%c0_3, %c0_4, %c0_5] : memref<2x8x32xbf16, #tpu.memory_space<vmem>>, vector<2x8x32xbf16>
    %6 = vector.shape_cast %5 : vector<2x8x32xbf16> to vector<16x32xbf16>
    %c0_6 = arith.constant 0 : index
    %c0_7 = arith.constant 0 : index
    %7 = vector.load %arg4[%c0_6, %c0_7] : memref<32x32xbf16, #tpu.memory_space<vmem>>, vector<32x32xbf16>
    %cst = arith.constant dense<0.000000e+00> : vector<16x32xf32>
    %8 = tpu.matmul %4, %7, %cst {dimension_numbers = #tpu.dot_dimension_numbers<[1], [0], [0], [1], [0, 0, 1, 1], [], []>} : vector<16x32xbf16>, vector<32x32xbf16>, vector<16x32xf32> -> vector<16x32xf32>
    %c0_8 = arith.constant 0 : index
    %c0_9 = arith.constant 0 : index
    %9 = vector.load %arg5[%c0_8, %c0_9] : memref<1x32xf32, #tpu.memory_space<vmem>>, vector<1x32xf32>
    %10 = vector.broadcast %9 : vector<1x32xf32> to vector<16x32xf32>
    %11 = arith.addf %8, %10 : vector<16x32xf32>
    %cst_10 = arith.constant 0.000000e+00 : f32
    %12 = vector.broadcast %cst_10 : f32 to vector<16x32xf32>
    %13 = arith.maximumf %11, %12 : vector<16x32xf32>
    %c0_11 = arith.constant 0 : index
    %c0_12 = arith.constant 0 : index
    %14 = vector.load %arg6[%c0_11, %c0_12] : memref<32x32xbf16, #tpu.memory_space<vmem>>, vector<32x32xbf16>
    %cst_13 = arith.constant dense<0.000000e+00> : vector<16x32xf32>
    %15 = tpu.matmul %6, %14, %cst_13 {dimension_numbers = #tpu.dot_dimension_numbers<[1], [0], [0], [1], [0, 0, 1, 1], [], []>} : vector<16x32xbf16>, vector<32x32xbf16>, vector<16x32xf32> -> vector<16x32xf32>
    %c0_14 = arith.constant 0 : index
    %c0_15 = arith.constant 0 : index
    %16 = vector.load %arg7[%c0_14, %c0_15] : memref<1x32xf32, #tpu.memory_space<vmem>>, vector<1x32xf32>
    %17 = vector.broadcast %16 : vector<1x32xf32> to vector<16x32xf32>
    %18 = arith.addf %15, %17 : vector<16x32xf32>
    %19 = math.tanh %18 : vector<16x32xf32>
    %20 = vector.shape_cast %13 : vector<16x32xf32> to vector<2x8x32xf32>
    %21 = vector.shape_cast %19 : vector<16x32xf32> to vector<2x8x32xf32>
    %c0_16 = arith.constant 0 : index
    %c0_17 = arith.constant 0 : index
    %22 = vector.load %arg9[%c0_16, %c0_17] : memref<2x64xf32, #tpu.memory_space<vmem>>, vector<2x32xf32>
    %cst_18 = arith.constant dense<0.000000e+00> : vector<2x32xf32>
    %23 = vector.multi_reduction <add>, %20, %cst_18 [1] : vector<2x8x32xf32> to vector<2x32xf32>
    %24 = arith.addf %22, %23 : vector<2x32xf32>
    %c0_19 = arith.constant 0 : index
    %c0_20 = arith.constant 0 : index
    %25 = vector.load %arg9[%c0_19, %c0_20] : memref<2x64xf32, #tpu.memory_space<vmem>>, vector<2x32xf32>
    tpu.vector_store %arg9[%c0_19, %c0_20], %24 {strides = array<i32>} : memref<2x64xf32, #tpu.memory_space<vmem>>, vector<2x32xf32>,
    %c0_21 = arith.constant 0 : index
    %c32 = arith.constant 32 : index
    %26 = vector.load %arg9[%c0_21, %c32] : memref<2x64xf32, #tpu.memory_space<vmem>>, vector<2x32xf32>
    %cst_22 = arith.constant dense<0.000000e+00> : vector<2x32xf32>
    %27 = vector.multi_reduction <add>, %21, %cst_22 [1] : vector<2x8x32xf32> to vector<2x32xf32>
    %28 = arith.addf %26, %27 : vector<2x32xf32>
    %c0_23 = arith.constant 0 : index
    %c32_24 = arith.constant 32 : index
    %29 = vector.load %arg9[%c0_23, %c32_24] : memref<2x64xf32, #tpu.memory_space<vmem>>, vector<2x32xf32>
    tpu.vector_store %arg9[%c0_23, %c32_24], %28 {strides = array<i32>} : memref<2x64xf32, #tpu.memory_space<vmem>>, vector<2x32xf32>,
    %c0_i32_25 = arith.constant 0 : i32
    %30 = arith.cmpi eq, %arg1, %c0_i32_25 : i32
    %31 = arith.extui %30 : i1 to i32
    %c0_i32_26 = arith.constant 0 : i32
    %32 = arith.cmpi ne, %31, %c0_i32_26 : i32
    scf.if %32 {
      %c0_27 = arith.constant 0 : index
      %c0_28 = arith.constant 0 : index
      %33 = vector.load %arg9[%c0_27, %c0_28] : memref<2x64xf32, #tpu.memory_space<vmem>>, vector<2x64xf32>
      %cst_29 = arith.constant 1.250000e-01 : f32
      %34 = vector.broadcast %cst_29 : f32 to vector<2x64xf32>
      %35 = arith.mulf %33, %34 : vector<2x64xf32>
      %c0_30 = arith.constant 0 : index
      %c0_31 = arith.constant 0 : index
      %36 = vector.load %arg8[%c0_30, %c0_31] : memref<2x64xf32, #tpu.memory_space<vmem>>, vector<2x64xf32>
      tpu.vector_store %arg8[%c0_30, %c0_31], %35 {strides = array<i32>} : memref<2x64xf32, #tpu.memory_space<vmem>>, vector<2x64xf32>,
    } else {
    }
    return
  }
  func.func @transform_0(%arg0: i32, %arg1: i32) -> (i32, i32, i32) {
    %c0_i32 = arith.constant 0 : i32
    %c0_i32_0 = arith.constant 0 : i32
    return %arg0, %arg1, %c0_i32 : i32, i32, i32
  }
  func.func @transform_1(%arg0: i32, %arg1: i32) -> (i32, i32, i32) {
    %c0_i32 = arith.constant 0 : i32
    %c0_i32_0 = arith.constant 0 : i32
    return %arg0, %arg1, %c0_i32 : i32, i32, i32
  }
  func.func @transform_2(%arg0: i32, %arg1: i32) -> (i32, i32) {
    %c0_i32 = arith.constant 0 : i32
    %c0_i32_0 = arith.constant 0 : i32
    %c0_i32_1 = arith.constant 0 : i32
    return %c0_i32, %c0_i32_0 : i32, i32
  }
  func.func @transform_3(%arg0: i32, %arg1: i32) -> (i32, i32) {
    %c0_i32 = arith.constant 0 : i32
    %c0_i32_0 = arith.constant 0 : i32
    %c0_i32_1 = arith.constant 0 : i32
    return %c0_i32, %c0_i32_0 : i32, i32
  }
  func.func @transform_4(%arg0: i32, %arg1: i32) -> (i32, i32) {
    %c0_i32 = arith.constant 0 : i32
    %c0_i32_0 = arith.constant 0 : i32
    %c0_i32_1 = arith.constant 0 : i32
    return %c0_i32, %c0_i32_0 : i32, i32
  }
  func.func @transform_5(%arg0: i32, %arg1: i32) -> (i32, i32) {
    %c0_i32 = arith.constant 0 : i32
    %c0_i32_0 = arith.constant 0 : i32
    %c0_i32_1 = arith.constant 0 : i32
    return %c0_i32, %c0_i32_0 : i32, i32
  }
  func.func @transform_6(%arg0: i32, %arg1: i32) -> (i32, i32) {
    %c0_i32 = arith.constant 0 : i32
    %c0_i32_0 = arith.constant 0 : i32
    return %arg0, %c0_i32 : i32, i32
  }
}

</mosaic_0001>

<bundles_post_ra>
// kernel: tpu_custom_call.1
= control target key start
LH: loop header
LB: loop body
LE: loop exit
PB: predicated region body
PF: predicated region fallthrough
CT: control target
= control target key end

     0   :  { %11 = vsyncpa [#allocation4], 0  ;;  %s625_s0 = inlined_call_operand.hbm [shape: bf16[2,8,32], index: 0, kind: input, shape index: {}]   ;;  %s626_s1 = inlined_call_operand.hbm [shape: bf16[2,8,32], index: 1, kind: input, shape index: {}]   ;;  %s627_s2 = inlined_call_operand.hbm [shape: bf16[32,32], index: 2, kind: input, shape index: {}]   ;;  %s628_s3 = inlined_call_operand.vmem [shape: f32[1,32], index: 3, kind: input, shape index: {}]   ;;  %s629_s4 = inlined_call_operand.hbm [shape: bf16[32,32], index: 4, kind: input, shape index: {}]   ;;  %s630_s5 = inlined_call_operand.vmem [shape: f32[1,32], index: 5, kind: input, shape index: {}]   ;;  %s631_s6 = inlined_call_operand.hbm [shape: f32[2,64], index: 6, kind: output, shape index: {}]  }
   0x1   :  { %12 = vsyncpa [#allocation7], 0 }
   0x2   :  { %13 = vsyncpa [#allocation10], 0 }
   0x3   :  { %14 = vsyncpa [#allocation5], 0  ;;  %s480_s21 = smov [#allocation6]   ;;  %s481_s23 = smov [#allocation3]  }
   0x4   :  { %s32_s22 = sshll.u32 %s480_s21, 4  ;;  %s20_s24 = sshll.u32 %s481_s23, 4  ;;  %s33_s22 = int_to_ptr.vmem [resolvable:$true] %s32_s22  ;;  %s525_s24 = int_to_ptr.vmem [resolvable:$true] %s20_s24 }
   0x5   :  { %s362_s27 = scalar_lea.hbm %s626_s1, 128 }
   0x6   :  { %p363_p0 = scmp.ne.s32.totalorder %s626_s1, %s362_s27  ;;  %p366_p1 = scmp.lt.u32.totalorder %s362_s27, %s626_s1 }
   0x8   :  { %p368_p2 = pnand %p366_p1, %p363_p0 }
   0xa   :  { %371 = shalt.err (!%p368_p2)
}
   0xb   :  { %s372_s8 = scalar_lea.vmem %s33_s22, 128  ;;  %p377_p4 = scmp.lt.s32.totalorder %s33_s22, %s33_s22 }
   0xc   :  { %p373_p3 = scmp.ne.s32.totalorder %s33_s22, %s372_s8  ;;  %p378_p5 = scmp.lt.s32.totalorder %s372_s8, %s372_s8 }
   0xe   :  { %p379_p6 = por %p378_p5, %p377_p4 }
  0x10   :  { %p380_p7 = pnand %p379_p6, %p373_p3 }
  0x12   :  { %383 = shalt.err (!%p380_p7)
}
  0x13   :  { %s482_s9 = smov 64   ;;  %s483_s10 = smov 4  }
  0x14   :  { %38 = dma.hbm_to_vmem [thread:$0]  %s626_s1, 128, %s33_s22, [#allocation7], %s482_s9, %s482_s9, %s483_s10  }
  0x15   :  { %s384_s15 = scalar_lea.hbm %s625_s0, 128 }
  0x16   :  { %p385_p8 = scmp.ne.s32.totalorder %s625_s0, %s384_s15  ;;  %p388_p9 = scmp.lt.u32.totalorder %s384_s15, %s625_s0 }
  0x18   :  { %p390_p10 = pnand %p388_p9, %p385_p8 }
  0x1a   :  { %393 = shalt.err (!%p390_p10)
}
  0x1b   :  { %s394_s20 = scalar_lea.vmem %s525_s24, 128  ;;  %p399_p12 = scmp.lt.s32.totalorder %s525_s24, %s525_s24 }
  0x1c   :  { %p395_p11 = scmp.ne.s32.totalorder %s525_s24, %s394_s20  ;;  %p400_p13 = scmp.lt.s32.totalorder %s394_s20, %s394_s20 }
  0x1e   :  { %p401_p0 = por %p400_p13, %p399_p12 }
  0x20   :  { %p402_p1 = pnand %p401_p0, %p395_p11 }
  0x22   :  { %405 = shalt.err (!%p402_p1)
}
  0x23   :  { %26 = dma.hbm_to_vmem [thread:$0]  %s625_s0, 128, %s525_s24, [#allocation4], %s482_s9, %s482_s9, %s483_s10  }
  0x24   :  { %s484_s22 = smov [#allocation8]   ;;  %s485_s25 = smov [#allocation9]  }
  0x25   :  { %s44_s23 = sshll.u32 %s484_s22, 4  ;;  %s58_s26 = sshll.u32 %s485_s25, 4  ;;  %s45_s23 = int_to_ptr.vmem [resolvable:$true] %s44_s23  ;;  %s562_s26 = int_to_ptr.vmem [resolvable:$true] %s58_s26 }
  0x26   :  { %s406_s29 = scalar_lea.hbm %s627_s2, 256 }
  0x27   :  { %p407_p2 = scmp.ne.s32.totalorder %s627_s2, %s406_s29  ;;  %p410_p3 = scmp.lt.u32.totalorder %s406_s29, %s627_s2 }
  0x29   :  { %p412_p4 = pnand %p410_p3, %p407_p2 }
  0x2b   :  { %415 = shalt.err (!%p412_p4)
}
  0x2c   :  { %s416_s0 = scalar_lea.vmem %s45_s23, 256  ;;  %p421_p6 = scmp.lt.s32.totalorder %s45_s23, %s45_s23 }
  0x2d   :  { %p417_p5 = scmp.ne.s32.totalorder %s45_s23, %s416_s0  ;;  %p422_p7 = scmp.lt.s32.totalorder %s416_s0, %s416_s0 }
  0x2f   :  { %p423_p8 = por %p422_p7, %p421_p6 }
  0x31   :  { %p424_p9 = pnand %p423_p8, %p417_p5 }
  0x33   :  { %427 = shalt.err (!%p424_p9)
}
  0x34   :  { %50 = dma.hbm_to_vmem [thread:$0]  %s627_s2, 256, %s45_s23, [#allocation7], %s482_s9, %s482_s9, %s483_s10  }
  0x35   :  { %s428_s15 = scalar_lea.hbm %s629_s4, 256 }
  0x36   :  { %p429_p10 = scmp.ne.s32.totalorder %s629_s4, %s428_s15  ;;  %p432_p11 = scmp.lt.u32.totalorder %s428_s15, %s629_s4 }
  0x38   :  { %p434_p12 = pnand %p432_p11, %p429_p10 }
  0x3a   :  { %437 = shalt.err (!%p434_p12)
}
  0x3b   :  { %s438_s20 = scalar_lea.vmem %s562_s26, 256  ;;  %p443_p0 = scmp.lt.s32.totalorder %s562_s26, %s562_s26 }
  0x3c   :  { %p439_p13 = scmp.ne.s32.totalorder %s562_s26, %s438_s20  ;;  %p444_p1 = scmp.lt.s32.totalorder %s438_s20, %s438_s20 }
  0x3e   :  { %p445_p2 = por %p444_p1, %p443_p0 }
  0x40   :  { %p446_p3 = pnand %p445_p2, %p439_p13 }
  0x42   :  { %449 = shalt.err (!%p446_p3)
}
  0x43   :  { %64 = dma.hbm_to_vmem [thread:$0]  %s629_s4, 256, %s562_s26, [#allocation10], %s482_s9, %s482_s9, %s483_s10  }
  0x44   :  { %472 = dma.done.wait [#allocation4], 128  }
  0x45   :  { %473 = vsyncadd [#allocation4], 4294967168 }
  0x46   :  { %474 = dma.done.wait [#allocation7], 384  }
  0x47   :  { %475 = vsyncadd [#allocation7], 4294966912 }
  0x48   :  { %476 = dma.done.wait [#allocation10], 256  }
  0x49   :  { %477 = vsyncadd [#allocation10], 4294967040  ;;  %v486_v0 = vmov 0.0   ;;  %vm487_vm0 = vmmov 0   ;;  %v352_v1 = vld [vmem:[#allocation9] sm:$0xff]   ;;  %v353_v2 = vld [vmem:[#allocation9 + $0x8] sm:$0xff]  }
  0x4a   :  { %334 = vmatprep.subr.bf16.mxu1 %v486_v0  ;;  %338 = vmatprep.mubr.msk.bf16.mxu1 %vm487_vm0, %v486_v0  ;;  %v355_v3 = vld [vmem:[#allocation8] sm:$0xff]   ;;  %v354_v4 = vld [vmem:[#allocation6] sm:$0xff]   ;;  %v356_v5 = vld [vmem:[#allocation8 + $0x8] sm:$0xff]   ;;  %vm118_vm1 = vcmask 261120   ;;  %vm84_vm2 = vcmask 517120   ;;  %vm256_vm3 = vcmask 1041409  }
  0x4b   :  { %326 = vmatprep.subr.bf16.mxu0 %v486_v0  ;;  %330 = vmatprep.mubr.msk.bf16.mxu0 %vm487_vm0, %v486_v0  ;;  %v357_v6 = vld [vmem:[#allocation3] sm:$0xff]   ;;  %85 = vst.msk [vmem:[#allocation2] sm:$0x3] %vm84_vm2, %v486_v0  ;;  %v315_v7 = vld [vmem:[%s630_s5] ss:$0 sm:$0xff]  ;;  %vm260_vm4 = vcmask 254976  }
  0x4c   :  { %335 = vmatpush3.bf16.msra.mxu1 %v352_v1  ;;  %327 = vmatpush3.bf16.msra.mxu0 %v355_v3  ;;  %v310_v11 = vld [vmem:[%s628_s3] ss:$0 sm:$0xff]  ;;  %s488_s3 = smov 32   ;;  %vm284_vm5 = vcmask 517376   ;;  %s489_s5 = smov [#allocation11]  }
  0x4d   :  { %336 = vmatprep.subr.bf16.mxu1 %v486_v0  ;;  %328 = vmatprep.subr.bf16.mxu0 %v486_v0  ;;  %s299_s22 = sshll.u32 %s489_s5, 4  ;;  %s300_s22 = int_to_ptr.vmem [resolvable:$true] %s299_s22 }
  0x4e   :  { %s450_s23 = scalar_lea.vmem %s300_s22, 32  ;;  %p455_p5 = scmp.lt.s32.totalorder %s300_s22, %s300_s22 }
  0x4f   :  { %p451_p4 = scmp.ne.s32.totalorder %s300_s22, %s450_s23  ;;  %p456_p6 = scmp.lt.s32.totalorder %s450_s23, %s450_s23 }
  0x50   :  { %337 = vmatpush3.bf16.msra.mxu1 %v353_v2  ;;  %329 = vmatpush3.bf16.msra.mxu0 %v356_v5 }
  0x51   :  { %p457_p7 = por %p456_p6, %p455_p5 }
  0x52   :  { %v239_v48 = vld [vmem:[#allocation2] sm:$0x3] }
  0x53   :  { %339 = vmatmul.mubr.msk.bf16.vlgmr.msra.gmra.mrb[0].mxu1 %vm118_vm1, %v354_v4  ;;  %331 = vmatmul.mubr.msk.bf16.vlgmr.msra.gmra.mrb[0].mxu0 %vm118_vm1, %v357_v6  ;;  %p458_p8 = pnand %p457_p7, %p451_p4 }
 0x126   :  { %v230_v8 = vpop.f32.mrb[0].mxu1  ;;  %v156_v15 = vpop.f32.mrb[0].mxu0 }
 0x127   :  { %v231_v9 = vadd.f32 %v315_v7, %v230_v8  ;;  %v340_v10 = vpop.f32.mrb[1].mxu1  ;;  %v157_v16 = vadd.f32 %v310_v11, %v156_v15  ;;  %v332_v17 = vpop.f32.mrb[1].mxu0 }
 0x128   :  { %v233_v12 = vpop.f32.mrb[2].mxu1  ;;  %v159_v18 = vpop.f32.mrb[2].mxu0 }
 0x129   :  { %358 = vtanh.f32 %v231_v9  ;;  %v234_v13 = vadd.f32 %v315_v7, %v233_v12  ;;  %v341_v14 = vpop.f32.mrb[3].mxu1  ;;  %v163_v19 = vmax.f32 %v157_v16, 0.0  ;;  %v160_v20 = vadd.f32 %v310_v11, %v159_v18  ;;  %v333_v21 = vpop.f32.mrb[3].mxu0 }
 0x12b   :  { %360 = vtanh.f32 %v234_v13  ;;  %v240_v22 = vsel %vm118_vm1, %v163_v19, 0.0  ;;  %v164_v23 = vmax.f32 %v160_v20, 0.0 }
 0x12c   :  { %v241_v24 = vrot.slane %v240_v22, 4 }
 0x12d   :  { %v247_v25 = vsel %vm118_vm1, %v164_v23, 0.0 }
 0x12e   :  { %v242_v26 = vadd.f32 %v241_v24, %v240_v22  ;;  %v248_v27 = vrot.slane %v247_v25, 4 }
 0x130   :  { %v243_v29 = vrot.slane %v242_v26, 2  ;;  %v249_v30 = vadd.f32 %v248_v27, %v247_v25 }
 0x132   :  { %v244_v34 = vadd.f32 %v243_v29, %v242_v26  ;;  %v250_v35 = vrot.slane %v249_v30, 2 }
 0x133   :  { %v359_v28 = vpop.eup %358 }
 0x134   :  { %v263_v31 = vsel %vm118_vm1, %v359_v28, 0.0  ;;  %v245_v39 = vrot.slane %v244_v34, 1  ;;  %v251_v40 = vadd.f32 %v250_v35, %v249_v30 }
 0x135   :  { %v361_v32 = vpop.eup %360  ;;  %v264_v33 = vrot.slane %v263_v31, 4 }
 0x136   :  { %v270_v36 = vsel %vm118_vm1, %v361_v32, 0.0  ;;  %v246_v43 = vadd.f32 %v245_v39, %v244_v34  ;;  %v252_v44 = vrot.slane %v251_v40, 1 }
 0x137   :  { %v265_v37 = vadd.f32 %v264_v33, %v263_v31  ;;  %v271_v38 = vrot.slane %v270_v36, 4 }
 0x138   :  { %v253_v47 = vadd.f32 %v252_v44, %v251_v40 }
 0x139   :  { %v266_v41 = vrot.slane %v265_v37, 2  ;;  %v272_v42 = vadd.f32 %v271_v38, %v270_v36 }
 0x13a   :  { %v257_v51 = vsel %vm256_vm3, %v253_v47, %v246_v43 }
 0x13b   :  { %v267_v45 = vadd.f32 %v266_v41, %v265_v37  ;;  %v273_v46 = vrot.slane %v272_v42, 2  ;;  %v259_v52 = vadd.f32 %v257_v51, %v239_v48 }
 0x13d   :  { %v268_v49 = vrot.slane %v267_v45, 1  ;;  %v274_v50 = vadd.f32 %v273_v46, %v272_v42  ;;  %261 = vst.msk [vmem:[#allocation2] sm:$0x3] %vm260_vm4, %v259_v52 }
 0x13f   :  { %v275_v53 = vrot.slane %v274_v50, 1  ;;  %v269_v54 = vadd.f32 %v268_v49, %v267_v45 }
 0x141   :  { %v276_v55 = vadd.f32 %v275_v53, %v274_v50 }
 0x143   :  { %v279_v56 = vsel %vm256_vm3, %v276_v55, %v269_v54 }
 0x144   :  { %280 = vrot.lane.b32.xlu0 %v279_v56, %s488_s3  ;;  %v262_v57 = vld [vmem:[#allocation2] sm:$0x3] }
 0x1b6   :  { %v281_v58 = vpop.permute.xlu0 %280 }
 0x1b7   :  { %v283_v59 = vadd.f32 %v281_v58, %v262_v57 }
 0x1b9   :  { %285 = vst.msk [vmem:[#allocation2] sm:$0x3] %vm284_vm5, %v283_v59 }
 0x1c0   :  { %v289_v60 = vld [vmem:[#allocation2] sm:$0x3] }
 0x1c1   :  { %v290_v61 = vmul.f32 0.125, %v289_v60 }
 0x1c3   :  { %292 = vst.msk [vmem:[#allocation11] sm:$0x3] %vm84_vm2, %v290_v61 }
 0x1c4   :  { %461 = shalt.err (!%p458_p8)
}
 0x1c5   :  { %s462_s27 = scalar_lea.hbm %s631_s6, 32 }
 0x1c6   :  { %p463_p9 = scmp.ne.s32.totalorder %s631_s6, %s462_s27  ;;  %p466_p10 = scmp.lt.u32.totalorder %s462_s27, %s631_s6 }
 0x1c8   :  { %p468_p11 = pnand %p466_p10, %p463_p9 }
 0x1ca   :  { %471 = shalt.err (!%p468_p11)
}
 0x1cb   :  { %302 = dma.vmem_to_hbm [thread:$0]  %s300_s22, 32, %s631_s6, [#allocation5]  }
 0x1cc   :  { %478 = dma.done.wait [#allocation5], 32  }
 0x1cd   :  { %479 = vsyncadd [#allocation5], 4294967264 }
 0x1ce   :  { %306 = vsyncpa [#allocation4], 1 }
 0x1cf   :  { %307 = vsyncpa [#allocation7], 1 }
 0x1d0   :  { %308 = vsyncpa [#allocation10], 1 }
 0x1d1   :  { %309 = vsyncpa [#allocation5], 1 }

// kernel: tpu_custom_call.1
= control target key start
LH: loop header
LB: loop body
LE: loop exit
PB: predicated region body
PF: predicated region fallthrough
CT: control target
= control target key end

     0   :  { %11 = vsyncpa [#allocation4], 0  ;;  %s625_s0 = inlined_call_operand.hbm [shape: bf16[2,8,32], index: 0, kind: input, shape index: {}]   ;;  %s626_s1 = inlined_call_operand.hbm [shape: bf16[2,8,32], index: 1, kind: input, shape index: {}]   ;;  %s627_s2 = inlined_call_operand.hbm [shape: bf16[32,32], index: 2, kind: input, shape index: {}]   ;;  %s628_s3 = inlined_call_operand.vmem [shape: f32[1,32], index: 3, kind: input, shape index: {}]   ;;  %s629_s4 = inlined_call_operand.hbm [shape: bf16[32,32], index: 4, kind: input, shape index: {}]   ;;  %s630_s5 = inlined_call_operand.vmem [shape: f32[1,32], index: 5, kind: input, shape index: {}]   ;;  %s631_s6 = inlined_call_operand.hbm [shape: f32[2,64], index: 6, kind: output, shape index: {}]  }
   0x1   :  { %12 = vsyncpa [#allocation7], 0 }
   0x2   :  { %13 = vsyncpa [#allocation10], 0 }
   0x3   :  { %14 = vsyncpa [#allocation5], 0  ;;  %s480_s21 = smov [#allocation6]   ;;  %s481_s23 = smov [#allocation3]  }
   0x4   :  { %s32_s22 = sshll.u32 %s480_s21, 4  ;;  %s20_s24 = sshll.u32 %s481_s23, 4  ;;  %s33_s22 = int_to_ptr.vmem [resolvable:$true] %s32_s22  ;;  %s525_s24 = int_to_ptr.vmem [resolvable:$true] %s20_s24 }
   0x5   :  { %s362_s27 = scalar_lea.hbm %s626_s1, 128 }
   0x6   :  { %p363_p0 = scmp.ne.s32.totalorder %s626_s1, %s362_s27  ;;  %p366_p1 = scmp.lt.u32.totalorder %s362_s27, %s626_s1 }
   0x8   :  { %p368_p2 = pnand %p366_p1, %p363_p0 }
   0xa   :  { %371 = shalt.err (!%p368_p2)
}
   0xb   :  { %s372_s8 = scalar_lea.vmem %s33_s22, 128  ;;  %p377_p4 = scmp.lt.s32.totalorder %s33_s22, %s33_s22 }
   0xc   :  { %p373_p3 = scmp.ne.s32.totalorder %s33_s22, %s372_s8  ;;  %p378_p5 = scmp.lt.s32.totalorder %s372_s8, %s372_s8 }
   0xe   :  { %p379_p6 = por %p378_p5, %p377_p4 }
  0x10   :  { %p380_p7 = pnand %p379_p6, %p373_p3 }
  0x12   :  { %383 = shalt.err (!%p380_p7)
}
  0x13   :  { %s482_s9 = smov 64   ;;  %s483_s10 = smov 4  }
  0x14   :  { %38 = dma.hbm_to_vmem [thread:$0]  %s626_s1, 128, %s33_s22, [#allocation7], %s482_s9, %s482_s9, %s483_s10  }
  0x15   :  { %s384_s15 = scalar_lea.hbm %s625_s0, 128 }
  0x16   :  { %p385_p8 = scmp.ne.s32.totalorder %s625_s0, %s384_s15  ;;  %p388_p9 = scmp.lt.u32.totalorder %s384_s15, %s625_s0 }
  0x18   :  { %p390_p10 = pnand %p388_p9, %p385_p8 }
  0x1a   :  { %393 = shalt.err (!%p390_p10)
}
  0x1b   :  { %s394_s20 = scalar_lea.vmem %s525_s24, 128  ;;  %p399_p12 = scmp.lt.s32.totalorder %s525_s24, %s525_s24 }
  0x1c   :  { %p395_p11 = scmp.ne.s32.totalorder %s525_s24, %s394_s20  ;;  %p400_p13 = scmp.lt.s32.totalorder %s394_s20, %s394_s20 }
  0x1e   :  { %p401_p0 = por %p400_p13, %p399_p12 }
  0x20   :  { %p402_p1 = pnand %p401_p0, %p395_p11 }
  0x22   :  { %405 = shalt.err (!%p402_p1)
}
  0x23   :  { %26 = dma.hbm_to_vmem [thread:$0]  %s625_s0, 128, %s525_s24, [#allocation4], %s482_s9, %s482_s9, %s483_s10  }
  0x24   :  { %s484_s22 = smov [#allocation8]   ;;  %s485_s25 = smov [#allocation9]  }
  0x25   :  { %s44_s23 = sshll.u32 %s484_s22, 4  ;;  %s58_s26 = sshll.u32 %s485_s25, 4  ;;  %s45_s23 = int_to_ptr.vmem [resolvable:$true] %s44_s23  ;;  %s562_s26 = int_to_ptr.vmem [resolvable:$true] %s58_s26 }
  0x26   :  { %s406_s29 = scalar_lea.hbm %s627_s2, 256 }
  0x27   :  { %p407_p2 = scmp.ne.s32.totalorder %s627_s2, %s406_s29  ;;  %p410_p3 = scmp.lt.u32.totalorder %s406_s29, %s627_s2 }
  0x29   :  { %p412_p4 = pnand %p410_p3, %p407_p2 }
  0x2b   :  { %415 = shalt.err (!%p412_p4)
}
  0x2c   :  { %s416_s0 = scalar_lea.vmem %s45_s23, 256  ;;  %p421_p6 = scmp.lt.s32.totalorder %s45_s23, %s45_s23 }
  0x2d   :  { %p417_p5 = scmp.ne.s32.totalorder %s45_s23, %s416_s0  ;;  %p422_p7 = scmp.lt.s32.totalorder %s416_s0, %s416_s0 }
  0x2f   :  { %p423_p8 = por %p422_p7, %p421_p6 }
  0x31   :  { %p424_p9 = pnand %p423_p8, %p417_p5 }
  0x33   :  { %427 = shalt.err (!%p424_p9)
}
  0x34   :  { %50 = dma.hbm_to_vmem [thread:$0]  %s627_s2, 256, %s45_s23, [#allocation7], %s482_s9, %s482_s9, %s483_s10  }
  0x35   :  { %s428_s15 = scalar_lea.hbm %s629_s4, 256 }
  0x36   :  { %p429_p10 = scmp.ne.s32.totalorder %s629_s4, %s428_s15  ;;  %p432_p11 = scmp.lt.u32.totalorder %s428_s15, %s629_s4 }
  0x38   :  { %p434_p12 = pnand %p432_p11, %p429_p10 }
  0x3a   :  { %437 = shalt.err (!%p434_p12)
}
  0x3b   :  { %s438_s20 = scalar_lea.vmem %s562_s26, 256  ;;  %p443_p0 = scmp.lt.s32.totalorder %s562_s26, %s562_s26 }
  0x3c   :  { %p439_p13 = scmp.ne.s32.totalorder %s562_s26, %s438_s20  ;;  %p444_p1 = scmp.lt.s32.totalorder %s438_s20, %s438_s20 }
  0x3e   :  { %p445_p2 = por %p444_p1, %p443_p0 }
  0x40   :  { %p446_p3 = pnand %p445_p2, %p439_p13 }
  0x42   :  { %449 = shalt.err (!%p446_p3)
}
  0x43   :  { %64 = dma.hbm_to_vmem [thread:$0]  %s629_s4, 256, %s562_s26, [#allocation10], %s482_s9, %s482_s9, %s483_s10  }
  0x44   :  { %472 = dma.done.wait [#allocation4], 128  }
  0x45   :  { %473 = vsyncadd [#allocation4], 4294967168 }
  0x46   :  { %474 = dma.done.wait [#allocation7], 384  }
  0x47   :  { %475 = vsyncadd [#allocation7], 4294966912 }
  0x48   :  { %476 = dma.done.wait [#allocation10], 256  }
  0x49   :  { %477 = vsyncadd [#allocation10], 4294967040  ;;  %v486_v0 = vmov 0.0   ;;  %vm487_vm0 = vmmov 0   ;;  %v352_v1 = vld [vmem:[#allocation9] sm:$0xff]   ;;  %v353_v2 = vld [vmem:[#allocation9 + $0x8] sm:$0xff]  }
  0x4a   :  { %334 = vmatprep.subr.bf16.mxu1 %v486_v0  ;;  %338 = vmatprep.mubr.msk.bf16.mxu1 %vm487_vm0, %v486_v0  ;;  %v355_v3 = vld [vmem:[#allocation8] sm:$0xff]   ;;  %v354_v4 = vld [vmem:[#allocation6] sm:$0xff]   ;;  %v356_v5 = vld [vmem:[#allocation8 + $0x8] sm:$0xff]   ;;  %vm118_vm1 = vcmask 261120   ;;  %vm84_vm2 = vcmask 517120   ;;  %vm256_vm3 = vcmask 1041409  }
  0x4b   :  { %326 = vmatprep.subr.bf16.mxu0 %v486_v0  ;;  %330 = vmatprep.mubr.msk.bf16.mxu0 %vm487_vm0, %v486_v0  ;;  %v357_v6 = vld [vmem:[#allocation3] sm:$0xff]   ;;  %85 = vst.msk [vmem:[#allocation2] sm:$0x3] %vm84_vm2, %v486_v0  ;;  %v315_v7 = vld [vmem:[%s630_s5] ss:$0 sm:$0xff]  ;;  %vm260_vm4 = vcmask 254976  }
  0x4c   :  { %335 = vmatpush3.bf16.msra.mxu1 %v352_v1  ;;  %327 = vmatpush3.bf16.msra.mxu0 %v355_v3  ;;  %v310_v11 = vld [vmem:[%s628_s3] ss:$0 sm:$0xff]  ;;  %s488_s3 = smov 32   ;;  %vm284_vm5 = vcmask 517376   ;;  %s489_s5 = smov [#allocation11]  }
  0x4d   :  { %336 = vmatprep.subr.bf16.mxu1 %v486_v0  ;;  %328 = vmatprep.subr.bf16.mxu0 %v486_v0  ;;  %s299_s22 = sshll.u32 %s489_s5, 4  ;;  %s300_s22 = int_to_ptr.vmem [resolvable:$true] %s299_s22 }
  0x4e   :  { %s450_s23 = scalar_lea.vmem %s300_s22, 32  ;;  %p455_p5 = scmp.lt.s32.totalorder %s300_s22, %s300_s22 }
  0x4f   :  { %p451_p4 = scmp.ne.s32.totalorder %s300_s22, %s450_s23  ;;  %p456_p6 = scmp.lt.s32.totalorder %s450_s23, %s450_s23 }
  0x50   :  { %337 = vmatpush3.bf16.msra.mxu1 %v353_v2  ;;  %329 = vmatpush3.bf16.msra.mxu0 %v356_v5 }
  0x51   :  { %p457_p7 = por %p456_p6, %p455_p5 }
  0x52   :  { %v239_v48 = vld [vmem:[#allocation2] sm:$0x3] }
  0x53   :  { %339 = vmatmul.mubr.msk.bf16.vlgmr.msra.gmra.mrb[0].mxu1 %vm118_vm1, %v354_v4  ;;  %331 = vmatmul.mubr.msk.bf16.vlgmr.msra.gmra.mrb[0].mxu0 %vm118_vm1, %v357_v6  ;;  %p458_p8 = pnand %p457_p7, %p451_p4 }
 0x126   :  { %v230_v8 = vpop.f32.mrb[0].mxu1  ;;  %v156_v15 = vpop.f32.mrb[0].mxu0 }
 0x127   :  { %v231_v9 = vadd.f32 %v315_v7, %v230_v8  ;;  %v340_v10 = vpop.f32.mrb[1].mxu1  ;;  %v157_v16 = vadd.f32 %v310_v11, %v156_v15  ;;  %v332_v17 = vpop.f32.mrb[1].mxu0 }
 0x128   :  { %v233_v12 = vpop.f32.mrb[2].mxu1  ;;  %v159_v18 = vpop.f32.mrb[2].mxu0 }
 0x129   :  { %358 = vtanh.f32 %v231_v9  ;;  %v234_v13 = vadd.f32 %v315_v7, %v233_v12  ;;  %v341_v14 = vpop.f32.mrb[3].mxu1  ;;  %v163_v19 = vmax.f32 %v157_v16, 0.0  ;;  %v160_v20 = vadd.f32 %v310_v11, %v159_v18  ;;  %v333_v21 = vpop.f32.mrb[3].mxu0 }
 0x12b   :  { %360 = vtanh.f32 %v234_v13  ;;  %v240_v22 = vsel %vm118_vm1, %v163_v19, 0.0  ;;  %v164_v23 = vmax.f32 %v160_v20, 0.0 }
 0x12c   :  { %v241_v24 = vrot.slane %v240_v22, 4 }
 0x12d   :  { %v247_v25 = vsel %vm118_vm1, %v164_v23, 0.0 }
 0x12e   :  { %v242_v26 = vadd.f32 %v241_v24, %v240_v22  ;;  %v248_v27 = vrot.slane %v247_v25, 4 }
 0x130   :  { %v243_v29 = vrot.slane %v242_v26, 2  ;;  %v249_v30 = vadd.f32 %v248_v27, %v247_v25 }
 0x132   :  { %v244_v34 = vadd.f32 %v243_v29, %v242_v26  ;;  %v250_v35 = vrot.slane %v249_v30, 2 }
 0x133   :  { %v359_v28 = vpop.eup %358 }
 0x134   :  { %v263_v31 = vsel %vm118_vm1, %v359_v28, 0.0  ;;  %v245_v39 = vrot.slane %v244_v34, 1  ;;  %v251_v40 = vadd.f32 %v250_v35, %v249_v30 }
 0x135   :  { %v361_v32 = vpop.eup %360  ;;  %v264_v33 = vrot.slane %v263_v31, 4 }
 0x136   :  { %v270_v36 = vsel %vm118_vm1, %v361_v32, 0.0  ;;  %v246_v43 = vadd.f32 %v245_v39, %v244_v34  ;;  %v252_v44 = vrot.slane %v251_v40, 1 }
 0x137   :  { %v265_v37 = vadd.f32 %v264_v33, %v263_v31  ;;  %v271_v38 = vrot.slane %v270_v36, 4 }
 0x138   :  { %v253_v47 = vadd.f32 %v252_v44, %v251_v40 }
 0x139   :  { %v266_v41 = vrot.slane %v265_v37, 2  ;;  %v272_v42 = vadd.f32 %v271_v38, %v270_v36 }
 0x13a   :  { %v257_v51 = vsel %vm256_vm3, %v253_v47, %v246_v43 }
 0x13b   :  { %v267_v45 = vadd.f32 %v266_v41, %v265_v37  ;;  %v273_v46 = vrot.slane %v272_v42, 2  ;;  %v259_v52 = vadd.f32 %v257_v51, %v239_v48 }
 0x13d   :  { %v268_v49 = vrot.slane %v267_v45, 1  ;;  %v274_v50 = vadd.f32 %v273_v46, %v272_v42  ;;  %261 = vst.msk [vmem:[#allocation2] sm:$0x3] %vm260_vm4, %v259_v52 }
 0x13f   :  { %v275_v53 = vrot.slane %v274_v50, 1  ;;  %v269_v54 = vadd.f32 %v268_v49, %v267_v45 }
 0x141   :  { %v276_v55 = vadd.f32 %v275_v53, %v274_v50 }
 0x143   :  { %v279_v56 = vsel %vm256_vm3, %v276_v55, %v269_v54 }
 0x144   :  { %280 = vrot.lane.b32.xlu0 %v279_v56, %s488_s3  ;;  %v262_v57 = vld [vmem:[#allocation2] sm:$0x3] }
 0x1b6   :  { %v281_v58 = vpop.permute.xlu0 %280 }
 0x1b7   :  { %v283_v59 = vadd.f32 %v281_v58, %v262_v57 }
 0x1b9   :  { %285 = vst.msk [vmem:[#allocation2] sm:$0x3] %vm284_vm5, %v283_v59 }
 0x1c0   :  { %v289_v60 = vld [vmem:[#allocation2] sm:$0x3] }
 0x1c1   :  { %v290_v61 = vmul.f32 0.125, %v289_v60 }
 0x1c3   :  { %292 = vst.msk [vmem:[#allocation11] sm:$0x3] %vm84_vm2, %v290_v61 }
 0x1c4   :  { %461 = shalt.err (!%p458_p8)
}
 0x1c5   :  { %s462_s27 = scalar_lea.hbm %s631_s6, 32 }
 0x1c6   :  { %p463_p9 = scmp.ne.s32.totalorder %s631_s6, %s462_s27  ;;  %p466_p10 = scmp.lt.u32.totalorder %s462_s27, %s631_s6 }
 0x1c8   :  { %p468_p11 = pnand %p466_p10, %p463_p9 }
 0x1ca   :  { %471 = shalt.err (!%p468_p11)
}
 0x1cb   :  { %302 = dma.vmem_to_hbm [thread:$0]  %s300_s22, 32, %s631_s6, [#allocation5]  }
 0x1cc   :  { %478 = dma.done.wait [#allocation5], 32  }
 0x1cd   :  { %479 = vsyncadd [#allocation5], 4294967264 }
 0x1ce   :  { %306 = vsyncpa [#allocation4], 1 }
 0x1cf   :  { %307 = vsyncpa [#allocation7], 1 }
 0x1d0   :  { %308 = vsyncpa [#allocation10], 1 }
 0x1d1   :  { %309 = vsyncpa [#allocation5], 1 }

</bundles_post_ra>
